<compile_context>
chip_gen: v7x
topology: tpu7x:2x2x1
jax: 0.10.0
libtpu: 0.0.40
codegen_flags: <defaults>
</compile_context>

<pallas_src>
import functools

import jax
import jax.numpy as jnp
from jax.experimental import pallas as pl
from jax.experimental.pallas import tpu as pltpu


def _copy_kernel(x_ref, o_ref):
    # Pure identity: straight VMEM copy of the current block.
    o_ref[...] = x_ref[...]


def _choose_lane_cols(total: int) -> int | None:
    """Largest multiple of 128 (capped at 16384) that divides `total`."""
    cap = min(total, 16384)
    best = None
    c = 128
    while c <= cap:
        if total % c == 0:
            best = c
        c += 128
    return best


def _identity_copy_2d(x2d: jax.Array, tile_rows: int) -> jax.Array:
    rows, cols = x2d.shape
    grid = (pl.cdiv(rows, tile_rows),)
    return pl.pallas_call(
        _copy_kernel,
        out_shape=jax.ShapeDtypeStruct(x2d.shape, x2d.dtype),
        grid=grid,
        in_specs=[pl.BlockSpec((tile_rows, cols), lambda i: (i, 0))],
        out_specs=pl.BlockSpec((tile_rows, cols), lambda i: (i, 0)),
        input_output_aliases={0: 0},
        compiler_params=pltpu.CompilerParams(
            dimension_semantics=("parallel",)),
    )(x2d)


@functools.partial(jax.jit, static_argnames=("name",))
def print_node_forward(x: jax.Array, name: str = "") -> jax.Array:
    """Pallas equivalent of PrintNode.forward: print name + shape, return x."""
    # Per-execution print (shape is static, so it is exact); unlike a plain
    # Python print this fires on every jitted call, like PyTorch's print.
    shape_str = str(tuple(x.shape))
    fmt = (f"{name} {shape_str}" if name else shape_str)
    jax.debug.print(fmt.replace("{", "{{").replace("}", "}}"))

    orig_shape = x.shape
    total = x.size
    itemsize = jnp.dtype(x.dtype).itemsize

    cols = _choose_lane_cols(total) if total % 128 == 0 else None
    if cols is not None:
        # Lane-dense slab: last dim is a (large) multiple of 128.
        rows = total // cols
        # Keep each block <= ~1 MiB so (in + out) * double-buffering fits
        # comfortably under every generation's scoped-VMEM limit (incl. v7x).
        budget_rows = max(1, (1 << 20) // (cols * itemsize))
        if rows <= 8 or budget_rows >= rows:
            tile_rows = rows                      # single full-extent block
        else:
            tile_rows = max(8, (budget_rows // 8) * 8)
        x2d = x.reshape(rows, cols)
    else:
        # Fallback for element counts not divisible by 128: one full-extent
        # (1, total) block — always layout-legal; only used for tiny/odd sizes.
        tile_rows = 1
        x2d = x.reshape(1, total)

    y2d = _identity_copy_2d(x2d, tile_rows)
    return y2d.reshape(orig_shape)


if __name__ == "__main__":
    key = jax.random.PRNGKey(0)
    # Small NCHW input consistent with a typical conv-net intermediate.
    x = jax.random.normal(key, (2, 4, 16, 16), dtype=jnp.float32)

    y = print_node_forward(x, name="print_node")
    y = jax.block_until_ready(y)

    assert y.shape == x.shape and y.dtype == x.dtype
    assert bool(jnp.all(y == x))
    print("KERNEL_OK")
</pallas_src>

<mosaic_0001>
module attributes {stable_mosaic.version = 11 : i64} {
  func.func @_copy_kernel(%arg0: i32, %arg1: memref<1x2048xf32, #tpu.memory_space<vmem>>, %arg2: memref<1x2048xf32, #tpu.memory_space<vmem>>) attributes {dimension_semantics = [#tpu.dimension_semantics<parallel>], iteration_bounds = array<i64: 1>, scalar_prefetch = 0 : i64, scratch_operands = 0 : i64, tpu.core_type = #tpu.core_type<tc>, window_params = [{transform_indices = @transform_0, window_bounds = array<i64: 1, 2048>}, {transform_indices = @transform_1, window_bounds = array<i64: 1, 2048>}]} {
    %c0 = arith.constant 0 : index
    %c0_0 = arith.constant 0 : index
    %0 = vector.load %arg1[%c0, %c0_0] : memref<1x2048xf32, #tpu.memory_space<vmem>>, vector<1x2048xf32>
    %c0_1 = arith.constant 0 : index
    %c0_2 = arith.constant 0 : index
    %1 = vector.load %arg2[%c0_1, %c0_2] : memref<1x2048xf32, #tpu.memory_space<vmem>>, vector<1x2048xf32>
    tpu.vector_store %arg2[%c0_1, %c0_2], %0 {strides = array<i32>} : memref<1x2048xf32, #tpu.memory_space<vmem>>, vector<1x2048xf32>,
    return
  }
  func.func @transform_0(%arg0: i32) -> (i32, i32) {
    %c0_i32 = arith.constant 0 : i32
    %c0_i32_0 = arith.constant 0 : i32
    return %arg0, %c0_i32 : i32, i32
  }
  func.func @transform_1(%arg0: i32) -> (i32, i32) {
    %c0_i32 = arith.constant 0 : i32
    %c0_i32_0 = arith.constant 0 : i32
    return %arg0, %c0_i32 : i32, i32
  }
}

</mosaic_0001>

<bundles_post_ra>
// kernel: print_node_forward.1
= control target key start
LH: loop header
LB: loop body
LE: loop exit
PB: predicated region body
PF: predicated region fallthrough
CT: control target
= control target key end

     0   :  { %s38_s0 = inlined_call_operand.vmem [shape: f32[1,2048], index: 0, kind: input, shape index: {}, may-alias: {0,1}]   ;;  %s39_s1 = inlined_call_operand.vmem [shape: f32[1,2048], index: 1, kind: output, shape index: {}, may-alias: {0,1}]  }
   0x1   :  { %v8_v0 = vld [vmem:[%s38_s0] sm:$0xff]  ;;  %v9_v1 = vld [vmem:[%s38_s0 + $0x8] sm:$0xff] }
   0x2   :  { %10 = vst [vmem:[%s39_s1] sm:$0xff] %v8_v0  ;;  %11 = vst [vmem:[%s39_s1 + $0x8] sm:$0xff] %v9_v1 }

</bundles_post_ra>
